<compile_context>
chip_gen: v6e
topology: v6e:2x2x1
jax: 0.10.0
libtpu: 0.0.40
codegen_flags: <defaults>
</compile_context>

<pallas_src>
import functools

import jax
import jax.numpy as jnp
from jax.experimental import pallas as pl
from jax.experimental.pallas import tpu as pltpu


def _round_up(x, m):
    return ((x + m - 1) // m) * m


def _sublane_tile(dtype):
    # Packed sublane granularity: 8 rows (4-byte), 16 (2-byte), 32 (1-byte).
    return {4: 8, 2: 16, 1: 32}.get(jnp.dtype(dtype).itemsize, 8)


# ---------------------------------------------------------------------------
# Kernels
# ---------------------------------------------------------------------------

def _bmm_fused_kernel(x_ref, y_ref, o_ref):
    # Small-matrix regime: whole (padded) matrices fit one tile and several
    # batches are fused per grid step. Single K step -> direct write, no acc.
    o_ref[...] = jnp.einsum(
        "bmk,bkn->bmn", x_ref[...], y_ref[...],
        preferred_element_type=jnp.float32,
    ).astype(o_ref.dtype)


def _bmm_tiled_single_k_kernel(x_ref, y_ref, o_ref):
    # General tiling, single K step: direct write, no accumulator.
    o_ref[...] = jnp.dot(
        x_ref[...], y_ref[...], preferred_element_type=jnp.float32
    ).astype(o_ref.dtype)


def _bmm_tiled_f32_kernel(x_ref, y_ref, o_ref, *, x_resident, tk):
    # Multi-K, float32 output: accumulate directly into the output block
    # (its block index is invariant along k, so it stays VMEM-resident).
    k = pl.program_id(3)

    @pl.when(k == 0)
    def _():
        o_ref[...] = jnp.zeros_like(o_ref)

    if x_resident:
        xs = x_ref[:, pl.ds(pl.multiple_of(k * tk, tk), tk)]
    else:
        xs = x_ref[...]
    o_ref[...] += jnp.dot(xs, y_ref[...], preferred_element_type=jnp.float32)


def _bmm_tiled_acc_kernel(x_ref, y_ref, o_ref, acc_ref, *, x_resident, tk):
    # Multi-K, non-f32 output: f32 scratch accumulator, cast at k == last.
    k = pl.program_id(3)

    @pl.when(k == 0)
    def _():
        acc_ref[...] = jnp.zeros_like(acc_ref)

    if x_resident:
        xs = x_ref[:, pl.ds(pl.multiple_of(k * tk, tk), tk)]
    else:
        xs = x_ref[...]
    acc_ref[...] += jnp.dot(xs, y_ref[...], preferred_element_type=jnp.float32)

    @pl.when(k == pl.num_programs(3) - 1)
    def _():
        o_ref[...] = acc_ref[...].astype(o_ref.dtype)


# ---------------------------------------------------------------------------
# Wrapper
# ---------------------------------------------------------------------------

@jax.jit
def batch_matmul(x, y):
    """Pallas equivalent of torch.bmm(x, y): (B,M,K) @ (B,K,N) -> (B,M,N)."""
    B, M, K = x.shape
    B2, K2, N = y.shape
    assert B == B2 and K == K2, "bmm shape mismatch"
    # TODO(synk): integer bmm is not supported (v7x MXU has no int path, and
    # f32-accumulate-then-cast does not match torch integer bmm semantics).
    out_dtype = jnp.result_type(x.dtype, y.dtype)

    x_is = jnp.dtype(x.dtype).itemsize
    y_is = jnp.dtype(y.dtype).itemsize
    o_is = jnp.dtype(out_dtype).itemsize

    # ---- Tile selection (MXU-aligned, dtype-aware sublane packing). ----
    TM = TN = TK = 512
    sub_m = max(_sublane_tile(x.dtype), _sublane_tile(out_dtype))
    tm = TM if M >= TM else _round_up(M, sub_m)
    tn = TN if N >= TN else _round_up(N, 128)   # lane-dense output
    tk = TK if K >= TK else _round_up(K, 128)

    Mp = _round_up(M, tm)
    Np = _round_up(N, tn)
    Kp = _round_up(K, tk)
    nk = Kp // tk

    # ---- Zero-pad M/K/N only (zero K-padding is exact); never pad B. ----
    xp = x if (Mp, Kp) == (M, K) else jnp.pad(x, ((0, 0), (0, Mp - M), (0, Kp - K)))
    yp = y if (Kp, Np) == (K, N) else jnp.pad(y, ((0, 0), (0, Kp - K), (0, Np - N)))

    small = (Mp == tm) and (Np == tn) and (Kp == tk)
    flops = 2 * B * M * N * K

    if small:
        # Fuse bt batches per grid step. bt = largest divisor of B that
        # (a) fits the VMEM budget and (b) keeps >= 2 parallel grid steps so
        # both v7x TensorCores get work.
        per_batch = tm * tk * x_is + tk * tn * y_is + tm * tn * o_is
        cap = max(1, (6 * 1024 * 1024) // per_batch)
        if B >= 2:
            cap = min(cap, B // 2)
        cap = min(cap, B)
        bt = 1
        for d in range(cap, 0, -1):
            if B % d == 0:
                bt = d
                break

        grid = (B // bt,)
        in_specs = [
            pl.BlockSpec((bt, tm, tk), lambda b: (b, 0, 0)),
            pl.BlockSpec((bt, tk, tn), lambda b: (b, 0, 0)),
        ]
        out_specs = pl.BlockSpec((bt, tm, tn), lambda b: (b, 0, 0))
        scratch_shapes = []
        kernel = _bmm_fused_kernel
        dim_sems = ("parallel",)
        working_set = 2 * bt * per_batch
        bytes_accessed = B * M * K * x_is + B * K * N * y_is + B * M * N * o_is
    else:
        # General tiled path: grid (B, M, N, K) with K last / "arbitrary".
        # Keep x's (tm, Kp) row panel resident across the j and k loops when
        # it fits, so it is not re-streamed Np/tn times from HBM.
        x_resident = (nk > 1) and (2 * tm * Kp * x_is <= 8 * 1024 * 1024)
        x_blk_k = Kp if x_resident else tk
        if x_resident:
            x_index = lambda b, i, j, k: (b, i, 0)
        else:
            x_index = lambda b, i, j, k: (b, i, k)

        grid = (B, Mp // tm, Np // tn, nk)
        in_specs = [
            pl.BlockSpec((None, tm, x_blk_k), x_index),
            pl.BlockSpec((None, tk, tn), lambda b, i, j, k: (b, k, j)),
        ]
        out_specs = pl.BlockSpec((None, tm, tn), lambda b, i, j, k: (b, i, j))

        if nk == 1:
            kernel = _bmm_tiled_single_k_kernel
            scratch_shapes = []
        elif out_dtype == jnp.float32:
            kernel = functools.partial(
                _bmm_tiled_f32_kernel, x_resident=x_resident, tk=tk)
            scratch_shapes = []
        else:
            kernel = functools.partial(
                _bmm_tiled_acc_kernel, x_resident=x_resident, tk=tk)
            scratch_shapes = [pltpu.VMEM((tm, tn), jnp.float32)]

        dim_sems = ("parallel", "parallel", "parallel", "arbitrary")
        working_set = 2 * (tm * x_blk_k * x_is + tk * tn * y_is + tm * tn * o_is)
        if scratch_shapes:
            working_set += tm * tn * 4
        x_reads = 1 if x_resident else (Np // tn)
        y_reads = Mp // tm
        bytes_accessed = (B * M * K * x_is * x_reads
                          + B * K * N * y_is * y_reads
                          + B * M * N * o_is)

    cost = pl.CostEstimate(
        flops=flops, transcendentals=0, bytes_accessed=int(bytes_accessed))

    # Explicit scoped-VMEM limit: covers the working set with headroom on all
    # generations (v5e's default is only 16 MiB), capped under v7x's 64 MiB
    # physical per-TC VMEM.
    vmem_limit = int(min(max(2 * working_set, 32 * 1024 * 1024),
                         64 * 1024 * 1024))

    out_p = pl.pallas_call(
        kernel,
        out_shape=jax.ShapeDtypeStruct((B, Mp, Np), out_dtype),
        grid_spec=pltpu.PrefetchScalarGridSpec(
            num_scalar_prefetch=0,
            grid=grid,
            in_specs=in_specs,
            out_specs=out_specs,
            scratch_shapes=scratch_shapes,
        ),
        compiler_params=pltpu.CompilerParams(
            dimension_semantics=dim_sems,
            vmem_limit_bytes=vmem_limit,
        ),
        cost_estimate=cost,
    )(xp, yp)

    if (Mp, Np) != (M, N):
        out_p = out_p[:, :M, :N]
    return out_p


if __name__ == "__main__":
    key = jax.random.PRNGKey(0)
    keys = jax.random.split(key, 12)

    def _check(x, y, atol, rtol, name):
        out = jax.block_until_ready(batch_matmul(x, y))
        ref = jnp.einsum("bmk,bkn->bmn",
                         x.astype(jnp.float32), y.astype(jnp.float32))
        assert out.shape == ref.shape, f"shape mismatch ({name})"
        ok = jnp.allclose(out.astype(jnp.float32), ref, atol=atol, rtol=rtol)
        assert ok, f"mismatch vs reference ({name})"

    # 1) Primary small case (batch=2, seq=8, hidden=32): fused path, bt=1.
    x = jax.random.normal(keys[0], (2, 8, 32), dtype=jnp.float32)
    y = jax.random.normal(keys[1], (2, 32, 16), dtype=jnp.float32)
    _check(x, y, 1e-5, 1e-5, "small")

    # 2) Tiny matrices, larger batch: fused path with bt > 1 (batch fusion).
    x = jax.random.normal(keys[2], (8, 8, 32), dtype=jnp.float32)
    y = jax.random.normal(keys[3], (8, 32, 16), dtype=jnp.float32)
    _check(x, y, 1e-5, 1e-5, "fused-batch")

    # 3) Non-tile-aligned single-tile shapes: exercises M/K/N zero-padding.
    x = jax.random.normal(keys[4], (3, 72, 160), dtype=jnp.float32)
    y = jax.random.normal(keys[5], (3, 160, 100), dtype=jnp.float32)
    _check(x, y, 1e-4, 1e-4, "padded-single-tile")

    # 4) Multi-K, f32 output: direct output-block accumulation + resident x.
    x = jax.random.normal(keys[6], (2, 72, 1100), dtype=jnp.float32)
    y = jax.random.normal(keys[7], (2, 1100, 200), dtype=jnp.float32)
    _check(x, y, 1e-3, 1e-4, "multi-k-f32")

    # 5) Multi-K, bf16 output: f32 scratch accumulator path.
    x = jax.random.normal(keys[8], (2, 40, 1050), dtype=jnp.bfloat16)
    y = jax.random.normal(keys[9], (2, 1050, 160), dtype=jnp.bfloat16)
    _check(x, y, 5e-1, 5e-2, "multi-k-bf16")

    # 6) M-tiled, single K step: single-K tiled fast path.
    x = jax.random.normal(keys[10], (2, 520, 96), dtype=jnp.float32)
    y = jax.random.normal(keys[11], (2, 96, 260), dtype=jnp.float32)
    _check(x, y, 1e-4, 1e-4, "m-tiled-single-k")

    print("KERNEL_OK")
</pallas_src>

<mosaic_0001>
module attributes {stable_mosaic.version = 11 : i64} {
  func.func @_bmm_fused_kernel(%arg0: i32, %arg1: memref<1x8x128xf32, #tpu.memory_space<vmem>>, %arg2: memref<1x128x128xf32, #tpu.memory_space<vmem>>, %arg3: memref<1x8x128xf32, #tpu.memory_space<vmem>>) attributes {dimension_semantics = [#tpu.dimension_semantics<parallel>], iteration_bounds = array<i64: 2>, scalar_prefetch = 0 : i64, scratch_operands = 0 : i64, tpu.core_type = #tpu.core_type<tc>, window_params = [{transform_indices = @transform_0, window_bounds = array<i64: 1, 8, 128>}, {transform_indices = @transform_1, window_bounds = array<i64: 1, 128, 128>}, {transform_indices = @transform_2, window_bounds = array<i64: 1, 8, 128>}]} {
    %c0 = arith.constant 0 : index
    %c0_0 = arith.constant 0 : index
    %c0_1 = arith.constant 0 : index
    %0 = vector.load %arg1[%c0, %c0_0, %c0_1] : memref<1x8x128xf32, #tpu.memory_space<vmem>>, vector<1x8x128xf32>
    %c0_2 = arith.constant 0 : index
    %c0_3 = arith.constant 0 : index
    %c0_4 = arith.constant 0 : index
    %1 = vector.load %arg2[%c0_2, %c0_3, %c0_4] : memref<1x128x128xf32, #tpu.memory_space<vmem>>, vector<1x128x128xf32>
    "tpu.trace_start"() <{level = 10 : i32, message = "bmk,bkn->bmn"}> : () -> ()
    %cst = arith.constant dense<0.000000e+00> : vector<1x8x128xf32>
    %2 = tpu.matmul %0, %1, %cst {dimension_numbers = #tpu.dot_dimension_numbers<[2], [1], [1], [2], [0, 0, 0, 1, 1, 2], [0], [0]>} : vector<1x8x128xf32>, vector<1x128x128xf32>, vector<1x8x128xf32> -> vector<1x8x128xf32>
    "tpu.trace_stop"() : () -> ()
    %c0_5 = arith.constant 0 : index
    %c0_6 = arith.constant 0 : index
    %c0_7 = arith.constant 0 : index
    %3 = vector.load %arg3[%c0_5, %c0_6, %c0_7] : memref<1x8x128xf32, #tpu.memory_space<vmem>>, vector<1x8x128xf32>
    tpu.vector_store %arg3[%c0_5, %c0_6, %c0_7], %2 {strides = array<i32>} : memref<1x8x128xf32, #tpu.memory_space<vmem>>, vector<1x8x128xf32>,
    return
  }
  func.func @transform_0(%arg0: i32) -> (i32, i32, i32) {
    %c0_i32 = arith.constant 0 : i32
    %c0_i32_0 = arith.constant 0 : i32
    %c0_i32_1 = arith.constant 0 : i32
    return %arg0, %c0_i32, %c0_i32_0 : i32, i32, i32
  }
  func.func @transform_1(%arg0: i32) -> (i32, i32, i32) {
    %c0_i32 = arith.constant 0 : i32
    %c0_i32_0 = arith.constant 0 : i32
    %c0_i32_1 = arith.constant 0 : i32
    return %arg0, %c0_i32, %c0_i32_0 : i32, i32, i32
  }
  func.func @transform_2(%arg0: i32) -> (i32, i32, i32) {
    %c0_i32 = arith.constant 0 : i32
    %c0_i32_0 = arith.constant 0 : i32
    %c0_i32_1 = arith.constant 0 : i32
    return %arg0, %c0_i32, %c0_i32_0 : i32, i32, i32
  }
}

</mosaic_0001>

<bundles_post_ra>
// kernel: batch_matmul.1
= control target key start
LH: loop header
LB: loop body
LE: loop exit
PB: predicated region body
PF: predicated region fallthrough
CT: control target
= control target key end

     0   :  { %7 = vsyncpa [#allocation3], 0  ;;  %s642_s0 = inlined_call_operand.vmem [shape: f32[2,8,128], index: 0, kind: input, shape index: {}]   ;;  %s643_s1 = inlined_call_operand.vmem [shape: f32[2,128,128], index: 1, kind: input, shape index: {}]   ;;  %s644_s2 = inlined_call_operand.hbm [shape: f32[2,8,128], index: 2, kind: output, shape index: {}]  }
   0x1   :  { %9 = vsyncpa [#allocation3 + $0x1], 0  ;;  %s518_s9 = smov 0   ;;  %s520_s10 = smov 0  }
   0x2   :  { %s522_s11 = smov 0   ;;  %s524_s12 = smov 0  }
   0x3 LB: > { %s539_s13 = sadd.s32 4294967295, %s498_s12   ;;  %s332_s14 = sadd.s32 4294967294, %s498_s12   ;;  %s498_s12 = sphi %s524_s12, %s650_s12   ;;  %s494_s11 = sphi %s522_s11, %s649_s11   ;;  %s490_s10 = sphi %s520_s10, %s648_s10   ;;  %s486_s9 = sphi %s518_s9, %s647_s9  }
   0x4   : > { %s543_s15 = sadd.s32 1, %s498_s12   ;;  %s74_s16 = sadd.s32 1, %s494_s11 }
   0x5   : > { %s71_s17 = ssub.s32 %s498_s12, %s543_s15  ;;  %p84_p0 = scmp.ne.s32.totalorder %s494_s11, %s490_s10 }
   0x6   : > { %p72_p1 = scmp.eq.s32.totalorder %s71_s17, 0  ;;  %p85_p2 = scmp.eq.s32.totalorder %s539_s13, 1 }
   0x7   : > { %p90_p3 = scmp.ne.s32.totalorder %s490_s10, %s486_s9  ;;  %p91_p4 = scmp.eq.s32.totalorder %s332_s14, 1 }
   0x8   : > { %s554_s18 = scalar_select %p72_p1, %s494_s11, %s74_s16  }
   0x9   : > { %p556_p5 = por %p85_p2, %p84_p0  ;;  %p560_p6 = por %p91_p4, %p90_p3 }
   0xa   : > { %p335_p7 = scmp.ge.s32.totalorder %s498_s12, 1  ;;  %p124_p8 = scmp.lt.s32.totalorder %s498_s12, 3 }
   0xc   : > { %p125_p9 = pnand %p335_p7, %p124_p8 }
   0xd   : > { %p150_p10 = scmp.lt.s32.totalorder (!%p125_p9), %s539_s13, 1  ;;  %s147_s30 = sand.u32 (!%p125_p9), 1, %s490_s10  }
   0xe   : > { %128 = sbr.rel (%p125_p9) target bundleno = 262 (0x106), region = 28  ;;  %s336_s3 = sshll.u32 (!%p125_p9), %s147_s30, 3 }
   0xf   : > { %s149_s4 = scalar_lea.vmem (!%p125_p9), [#allocation2], %s336_s3  ;;  %s341_s6 = sshll.u32 (!%p125_p9), %s539_s13, 7 }
  0x10   : > { %s261_s5 = sshll.u32 (!%p125_p9), %s149_s4, 4  ;;  %s603_s14 = scalar_lea.hbm (!%p125_p9), %s644_s2, %s341_s6  ;;  %s598_s5 = int_to_ptr.vmem [resolvable:$true] %s261_s5 }
  0x11   : > { %s248_s16 = scalar_lea.sflag (!%p125_p9), [#allocation3], %s147_s30  ;;  %s438_s17 = scalar_lea.vmem (!%p125_p9), %s598_s5, 128 }
  0x12   : > { %p439_p11 = scmp.ne.s32.totalorder (!%p125_p9), %s598_s5, %s438_s17 }
  0x13   : > { %v500_v0 = vmov 0.0   ;;  %vm501_vm0 = vmmov 0   ;;  %s568_s21 = scalar_select %p150_p10, %s539_s13, 1 }
  0x14   : > { %362 = vmatprep.subr.mxu0 %v500_v0  ;;  %394 = vmatprep.mubr.msk.f32.mxu0 %vm501_vm0, %v500_v0  ;;  %p440_p12 = pnand %p439_p11, %p556_p5  ;;  %s502_s13 = smov [#allocation2]  }
  0x15   : > { %s344_s22 = sshll.u32 %s568_s21, 7  ;;  %s337_s26 = sshll.u32 %s568_s21, 3 }
  0x16   : > { %s574_s25 = scalar_lea.vmem %s643_s1, %s344_s22  ;;  %s153_s29 = scalar_lea.vmem %s642_s0, %s337_s26 }
  0x17   : > { %v175_v1 = vld [vmem:[%s574_s25 + $0x78] sm:$0xff]  ;;  %v174_v2 = vld [vmem:[%s574_s25 + $0x70] sm:$0xff]  ;;  %v173_v3 = vld [vmem:[%s574_s25 + $0x68] sm:$0xff]  ;;  %p441_p13 = pneg %p440_p12  ;;  %s442_s21 = sshll.u32 %s502_s13, 4  ;;  %s443_s21 = int_to_ptr.vmem [resolvable:$false] %s442_s21 }
  0x18   : > { %363 = vmatpush3.msra.mxu0 %v175_v1  ;;  %v172_v4 = vld [vmem:[%s574_s25 + $0x60] sm:$0xff]  ;;  %v171_v5 = vld [vmem:[%s574_s25 + $0x58] sm:$0xff]  ;;  %v170_v6 = vld [vmem:[%s574_s25 + $0x50] sm:$0xff]  ;;  %s444_s22 = scalar_lea.vmem %s443_s21, 256  ;;  %p445_p0 = scmp.lt.s32.totalorder %s598_s5, %s443_s21 }
  0x19   : > { %364 = vmatprep.subr.mxu0 %v500_v0  ;;  %v169_v7 = vld [vmem:[%s574_s25 + $0x48] sm:$0xff]  ;;  %v168_v8 = vld [vmem:[%s574_s25 + $0x40] sm:$0xff]  ;;  %v167_v9 = vld [vmem:[%s574_s25 + $0x38] sm:$0xff]  ;;  %p446_p1 = scmp.lt.s32.totalorder %s444_s22, %s438_s17 }
  0x1a   : > { %365 = vmatpush3.msra.mxu0 %v174_v2  ;;  %v166_v10 = vld [vmem:[%s574_s25 + $0x30] sm:$0xff]  ;;  %v165_v11 = vld [vmem:[%s574_s25 + $0x28] sm:$0xff]  ;;  %v164_v12 = vld [vmem:[%s574_s25 + $0x20] sm:$0xff] }
  0x1b   : > { %366 = vmatprep.subr.mxu0 %v500_v0  ;;  %v163_v13 = vld [vmem:[%s574_s25 + $0x18] sm:$0xff]  ;;  %v162_v14 = vld [vmem:[%s574_s25 + $0x10] sm:$0xff]  ;;  %v161_v15 = vld [vmem:[%s574_s25 + $0x8] sm:$0xff]  ;;  %p447_p2 = por %p446_p1, %p445_p0 }
  0x1c   : > { %367 = vmatpush3.msra.mxu0 %v173_v3  ;;  %v160_v16 = vld [vmem:[%s574_s25] sm:$0xff] }
  0x1d   : > { %368 = vmatprep.subr.mxu0 %v500_v0  ;;  %v159_v17 = vld [vmem:[%s153_s29] sm:$0xff]  ;;  %p448_p3 = pnand %p447_p2, %p441_p13 }
  0x1e   : > { %369 = vmatpush3.msra.mxu0 %v172_v4 }
  0x1f   : > { %370 = vmatprep.subr.mxu0 %v500_v0 }
  0x20   : > { %371 = vmatpush3.msra.mxu0 %v171_v5 }
  0x21   : > { %372 = vmatprep.subr.mxu0 %v500_v0 }
  0x22   : > { %373 = vmatpush3.msra.mxu0 %v170_v6 }
  0x23   : > { %374 = vmatprep.subr.mxu0 %v500_v0 }
  0x24   : > { %375 = vmatpush3.msra.mxu0 %v169_v7 }
  0x25   : > { %376 = vmatprep.subr.mxu0 %v500_v0 }
  0x26   : > { %377 = vmatpush3.msra.mxu0 %v168_v8 }
  0x27   : > { %378 = vmatprep.subr.mxu0 %v500_v0 }
  0x28   : > { %379 = vmatpush3.msra.mxu0 %v167_v9 }
  0x29   : > { %380 = vmatprep.subr.mxu0 %v500_v0 }
  0x2a   : > { %381 = vmatpush3.msra.mxu0 %v166_v10 }
  0x2b   : > { %382 = vmatprep.subr.mxu0 %v500_v0 }
  0x2c   : > { %383 = vmatpush3.msra.mxu0 %v165_v11 }
  0x2d   : > { %384 = vmatprep.subr.mxu0 %v500_v0 }
  0x2e   : > { %385 = vmatpush3.msra.mxu0 %v164_v12 }
  0x2f   : > { %386 = vmatprep.subr.mxu0 %v500_v0 }
  0x30   : > { %387 = vmatpush3.msra.mxu0 %v163_v13 }
  0x31   : > { %388 = vmatprep.subr.mxu0 %v500_v0 }
  0x32   : > { %389 = vmatpush3.msra.mxu0 %v162_v14 }
  0x33   : > { %390 = vmatprep.subr.mxu0 %v500_v0 }
  0x34   : > { %391 = vmatpush3.msra.mxu0 %v161_v15 }
  0x35   : > { %392 = vmatprep.subr.mxu0 %v500_v0 }
  0x36   : > { %393 = vmatpush3.msra.mxu0 %v160_v16 }
  0x37   : > { %395 = vmatmul.mubr.f32.vlgmr.msra.gmra.mxu0 %v159_v17 }
  0xf7   : > { %v242_v18 = vpop.f32.mrf.mxu0 }
  0xf8   : > { %246 = vst [vmem:[%s149_s4] sm:$0xff] %v242_v18 }
  0xf9   : > { %v396_v19 = vpop.f32.mrf.mxu0 }
  0xfa   : > { %451 = shalt.err (!%p448_p3)
}
  0xfb   : > { %s452_s23 = scalar_lea.hbm %s603_s14, 128  ;;  %s456_s26 = scalar_lea.hbm %s644_s2, 256 }
  0xfc   : > { %p453_p4 = scmp.ne.s32.totalorder %s603_s14, %s452_s23  ;;  %p457_p9 = scmp.lt.s32.totalorder %s603_s14, %s644_s2 }
  0xfd   : > { %p458_p10 = scmp.lt.s32.totalorder %s456_s26, %s452_s23 }
  0xfe   : > { %p454_p7 = pnand %p453_p4, %p556_p5 }
  0xff   : > { %p459_p11 = por %p458_p10, %p457_p9 }
 0x100   : > { %p455_p8 = pneg %p454_p7 }
 0x102   : > { %p460_p12 = pnand %p459_p11, %p455_p8 }
 0x104   : > { %463 = shalt.err (!%p460_p12)
}
 0x105   : > { %397 = dma.vmem_to_hbm [thread:$0]  (%p556_p5), %s598_s5, 128, %s603_s14, %s248_s16  }
 0x106 PF: > { %p403_p13 = scmp.ge.s32.totalorder %s498_s12, 2  ;;  %s273_s29 = sand.u32 1, %s486_s9  }
 0x107   : > { %s274_s30 = scalar_lea.sflag [#allocation3], %s273_s29 }
 0x108   : > { %p400_p0 = pnand %p403_p13, %p560_p6 }
 0x10a   : > { %p401_p1 = pneg %p400_p0 }
 0x10c   : > { %481 = dma.done.wait (%p401_p1), %s274_s30, 128  }
 0x10d   : > { %483 = vsyncadd (%p401_p1), %s274_s30, 4294967168  ;;  %p12_p2 = scmp.ge.s32.totalorder %s543_s15, 4   ;;  %s647_s9 = smov %s490_s10 }
 0x10e   : > { %s648_s10 = smov %s494_s11  ;;  %s649_s11 = smov %s554_s18 }
 0x10f   : > { %s650_s12 = smov %s543_s15  ;;  %14 = sbr.rel (!%p12_p2) target bundleno = 3 (0x3), region = 66 }
 0x114   :  { %279 = vsyncpa [#allocation3], 1 }
 0x115   :  { %281 = vsyncpa [#allocation3 + $0x1], 1 }

</bundles_post_ra>
